<compile_context>
chip_gen: v6e
topology: v6e:2x2x1
jax: 0.10.0
libtpu: 0.0.40
codegen_flags: <defaults>
</compile_context>

<pallas_src>
import jax
import jax.numpy as jnp
from jax.experimental import pallas as pl
from jax.experimental.pallas import tpu as pltpu

IN_FEATURES = 178
HIDDEN = 16
OUT_FEATURES = 5
OUT_PAD = 8  # narrow padded output width (full last dim of the output array)


def mymlp_kernel(x_ref, w1_ref, b1_ref, w2_ref, b2_ref, o_ref):
    # x_ref: (tile_b, 178) f32      w1_ref: (178, 16) bf16   b1_ref: (1, 16) f32
    # w2_ref: (16, 8) bf16 (padded) b2_ref: (1, 8) f32 (padded)
    x = x_ref[...].astype(jnp.bfloat16)                     # free VPU cast under the x DMA
    h = jnp.dot(x, w1_ref[...],
                preferred_element_type=jnp.float32)         # (tile_b, 16) f32 acc
    h = jnp.tanh(h + b1_ref[...])                           # f32 bias + tanh (EUP)
    y = jnp.dot(h.astype(jnp.bfloat16), w2_ref[...],
                preferred_element_type=jnp.float32)         # (tile_b, 8) f32 acc
    o_ref[...] = (y + b2_ref[...]).astype(o_ref.dtype)      # narrow f32 store


def _round8(n):
    return max(8, ((n + 7) // 8) * 8)


def mymlp_forward(x, w1, b1, w2, b2, *, tile_b=2048):
    """x: (B, 178) f32. w1: (178,16), b1: (1,16), w2: (16,5), b2: (1,5)."""
    B = x.shape[0]
    x = x.astype(jnp.float32)

    # Batch tile: multiple of 8, no larger than requested, and capped at ~half
    # the batch so v7x's two TensorCores both get grid steps to shard.
    half_b = (B + 1) // 2
    tile = min(_round8(tile_b), _round8(half_b), _round8(B))
    num_tiles = pl.cdiv(B, tile)

    # Weights are tiny and VMEM-resident; cast them once in the wrapper.
    w1_b = w1.astype(jnp.bfloat16)
    b1_f = b1.reshape(1, HIDDEN).astype(jnp.float32)

    # Narrow padded output: pad second-layer weight/bias to 8 output columns.
    w2_p = jnp.zeros((HIDDEN, OUT_PAD), jnp.bfloat16)
    w2_p = w2_p.at[:, :OUT_FEATURES].set(w2.astype(jnp.bfloat16))
    b2_p = jnp.zeros((1, OUT_PAD), jnp.float32)
    b2_p = b2_p.at[:, :OUT_FEATURES].set(
        b2.reshape(1, OUT_FEATURES).astype(jnp.float32))

    out_padded = pl.pallas_call(
        mymlp_kernel,
        out_shape=jax.ShapeDtypeStruct((B, OUT_PAD), jnp.float32),
        grid=(num_tiles,),
        in_specs=[
            pl.BlockSpec((tile, IN_FEATURES), lambda i: (i, 0)),    # x: tiled over batch
            pl.BlockSpec((IN_FEATURES, HIDDEN), lambda i: (0, 0)),  # w1: resident
            pl.BlockSpec((1, HIDDEN), lambda i: (0, 0)),            # b1: resident
            pl.BlockSpec((HIDDEN, OUT_PAD), lambda i: (0, 0)),      # w2 (padded): resident
            pl.BlockSpec((1, OUT_PAD), lambda i: (0, 0)),           # b2 (padded): resident
        ],
        out_specs=pl.BlockSpec((tile, OUT_PAD), lambda i: (i, 0)),
        compiler_params=pltpu.CompilerParams(
            dimension_semantics=("parallel",),  # v7x: shard batch tiles across both TCs
        ),
    )(x, w1_b, b1_f, w2_p, b2_p)

    return out_padded[:, :OUT_FEATURES]


def init_params(key):
    # nn.Linear-style init; weights stored transposed ([in, out]).
    k1, k2, k3, k4 = jax.random.split(key, 4)
    lim1 = 1.0 / jnp.sqrt(float(IN_FEATURES))
    lim2 = 1.0 / jnp.sqrt(float(HIDDEN))
    w1 = jax.random.uniform(k1, (IN_FEATURES, HIDDEN), jnp.float32, -lim1, lim1)
    b1 = jax.random.uniform(k2, (1, HIDDEN), jnp.float32, -lim1, lim1)
    w2 = jax.random.uniform(k3, (HIDDEN, OUT_FEATURES), jnp.float32, -lim2, lim2)
    b2 = jax.random.uniform(k4, (1, OUT_FEATURES), jnp.float32, -lim2, lim2)
    return w1, b1, w2, b2


if __name__ == "__main__":
    key = jax.random.PRNGKey(0)
    kx, kp = jax.random.split(key)

    # B=100 with tile_b=32 exercises a multi-tile grid + a ragged last block.
    B = 100
    x = jax.random.normal(kx, (B, IN_FEATURES), jnp.float32)
    w1, b1, w2, b2 = init_params(kp)

    out = mymlp_forward(x, w1, b1, w2, b2, tile_b=32)
    out = jax.block_until_ready(out)

    # Reference in plain JAX on the same bf16-rounded matmul operands
    # (f32 accumulation), matching the kernel's numerics.
    xr = x.astype(jnp.bfloat16).astype(jnp.float32)
    w1r = w1.astype(jnp.bfloat16).astype(jnp.float32)
    w2r = w2.astype(jnp.bfloat16).astype(jnp.float32)
    h_ref = jnp.tanh(xr @ w1r + b1)
    ref = h_ref.astype(jnp.bfloat16).astype(jnp.float32) @ w2r + b2

    assert out.shape == (B, OUT_FEATURES)
    assert jnp.allclose(out, ref, atol=2e-3, rtol=2e-3), (
        float(jnp.max(jnp.abs(out - ref))))

    print("KERNEL_OK")
</pallas_src>

<mosaic_0001>
module attributes {stable_mosaic.version = 11 : i64} {
  func.func @mymlp_kernel(%arg0: i32, %arg1: memref<32x178xf32, #tpu.memory_space<vmem>>, %arg2: memref<178x16xbf16, #tpu.memory_space<vmem>>, %arg3: memref<1x16xf32, #tpu.memory_space<vmem>>, %arg4: memref<16x8xbf16, #tpu.memory_space<vmem>>, %arg5: memref<1x8xf32, #tpu.memory_space<vmem>>, %arg6: memref<32x8xf32, #tpu.memory_space<vmem>>) attributes {dimension_semantics = [#tpu.dimension_semantics<parallel>], iteration_bounds = array<i64: 4>, scalar_prefetch = 0 : i64, scratch_operands = 0 : i64, tpu.core_type = #tpu.core_type<tc>, window_params = [{transform_indices = @transform_0, window_bounds = array<i64: 32, 178>}, {pipeline_mode = #tpu.pipeline_mode<synchronous>, transform_indices = @transform_1, window_bounds = array<i64: 178, 16>}, {pipeline_mode = #tpu.pipeline_mode<synchronous>, transform_indices = @transform_2, window_bounds = array<i64: 1, 16>}, {pipeline_mode = #tpu.pipeline_mode<synchronous>, transform_indices = @transform_3, window_bounds = array<i64: 16, 8>}, {pipeline_mode = #tpu.pipeline_mode<synchronous>, transform_indices = @transform_4, window_bounds = array<i64: 1, 8>}, {transform_indices = @transform_5, window_bounds = array<i64: 32, 8>}]} {
    %c0 = arith.constant 0 : index
    %c0_0 = arith.constant 0 : index
    %0 = vector.load %arg1[%c0, %c0_0] : memref<32x178xf32, #tpu.memory_space<vmem>>, vector<32x178xf32>
    %1 = arith.truncf %0 : vector<32x178xf32> to vector<32x178xbf16>
    %c0_1 = arith.constant 0 : index
    %c0_2 = arith.constant 0 : index
    %2 = vector.load %arg2[%c0_1, %c0_2] : memref<178x16xbf16, #tpu.memory_space<vmem>>, vector<178x16xbf16>
    %cst = arith.constant dense<0.000000e+00> : vector<32x16xf32>
    %3 = tpu.matmul %1, %2, %cst {dimension_numbers = #tpu.dot_dimension_numbers<[1], [0], [0], [1], [0, 0, 1, 1], [], []>} : vector<32x178xbf16>, vector<178x16xbf16>, vector<32x16xf32> -> vector<32x16xf32>
    %c0_3 = arith.constant 0 : index
    %c0_4 = arith.constant 0 : index
    %4 = vector.load %arg3[%c0_3, %c0_4] : memref<1x16xf32, #tpu.memory_space<vmem>>, vector<1x16xf32>
    %5 = vector.broadcast %4 : vector<1x16xf32> to vector<32x16xf32>
    %6 = arith.addf %3, %5 : vector<32x16xf32>
    %7 = math.tanh %6 : vector<32x16xf32>
    %8 = arith.truncf %7 : vector<32x16xf32> to vector<32x16xbf16>
    %c0_5 = arith.constant 0 : index
    %c0_6 = arith.constant 0 : index
    %9 = vector.load %arg4[%c0_5, %c0_6] : memref<16x8xbf16, #tpu.memory_space<vmem>>, vector<16x8xbf16>
    %cst_7 = arith.constant dense<0.000000e+00> : vector<32x8xf32>
    %10 = tpu.matmul %8, %9, %cst_7 {dimension_numbers = #tpu.dot_dimension_numbers<[1], [0], [0], [1], [0, 0, 1, 1], [], []>} : vector<32x16xbf16>, vector<16x8xbf16>, vector<32x8xf32> -> vector<32x8xf32>
    %c0_8 = arith.constant 0 : index
    %c0_9 = arith.constant 0 : index
    %11 = vector.load %arg5[%c0_8, %c0_9] : memref<1x8xf32, #tpu.memory_space<vmem>>, vector<1x8xf32>
    %12 = vector.broadcast %11 : vector<1x8xf32> to vector<32x8xf32>
    %13 = arith.addf %10, %12 : vector<32x8xf32>
    %c0_10 = arith.constant 0 : index
    %c0_11 = arith.constant 0 : index
    %14 = vector.load %arg6[%c0_10, %c0_11] : memref<32x8xf32, #tpu.memory_space<vmem>>, vector<32x8xf32>
    tpu.vector_store %arg6[%c0_10, %c0_11], %13 {strides = array<i32>} : memref<32x8xf32, #tpu.memory_space<vmem>>, vector<32x8xf32>,
    return
  }
  func.func @transform_0(%arg0: i32) -> (i32, i32) {
    %c0_i32 = arith.constant 0 : i32
    %c0_i32_0 = arith.constant 0 : i32
    return %arg0, %c0_i32 : i32, i32
  }
  func.func @transform_1(%arg0: i32) -> (i32, i32) {
    %c0_i32 = arith.constant 0 : i32
    %c0_i32_0 = arith.constant 0 : i32
    %c0_i32_1 = arith.constant 0 : i32
    return %c0_i32, %c0_i32_0 : i32, i32
  }
  func.func @transform_2(%arg0: i32) -> (i32, i32) {
    %c0_i32 = arith.constant 0 : i32
    %c0_i32_0 = arith.constant 0 : i32
    %c0_i32_1 = arith.constant 0 : i32
    return %c0_i32, %c0_i32_0 : i32, i32
  }
  func.func @transform_3(%arg0: i32) -> (i32, i32) {
    %c0_i32 = arith.constant 0 : i32
    %c0_i32_0 = arith.constant 0 : i32
    %c0_i32_1 = arith.constant 0 : i32
    return %c0_i32, %c0_i32_0 : i32, i32
  }
  func.func @transform_4(%arg0: i32) -> (i32, i32) {
    %c0_i32 = arith.constant 0 : i32
    %c0_i32_0 = arith.constant 0 : i32
    %c0_i32_1 = arith.constant 0 : i32
    return %c0_i32, %c0_i32_0 : i32, i32
  }
  func.func @transform_5(%arg0: i32) -> (i32, i32) {
    %c0_i32 = arith.constant 0 : i32
    %c0_i32_0 = arith.constant 0 : i32
    return %arg0, %c0_i32 : i32, i32
  }
}

</mosaic_0001>

<bundles_post_ra>
// kernel: tpu_custom_call.1
= control target key start
LH: loop header
LB: loop body
LE: loop exit
PB: predicated region body
PF: predicated region fallthrough
CT: control target
= control target key end

     0   :  { %s1022_s18 = smov 0   ;;  %s1024_s19 = smov 0   ;;  %s1179_s0 = inlined_call_operand.vmem [shape: f32[100,178], index: 0, kind: input, shape index: {}]   ;;  %s1180_s1 = inlined_call_operand.vmem [shape: bf16[178,16], index: 1, kind: input, shape index: {}]   ;;  %s1181_s2 = inlined_call_operand.vmem [shape: f32[1,16], index: 2, kind: input, shape index: {}]   ;;  %s1182_s3 = inlined_call_operand.vmem [shape: bf16[16,8], index: 3, kind: input, shape index: {}]   ;;  %s1183_s4 = inlined_call_operand.vmem [shape: f32[1,8], index: 4, kind: input, shape index: {}]   ;;  %s1184_s5 = inlined_call_operand.vmem [shape: f32[100,8], index: 5, kind: output, shape index: {}]  }
   0x1   :  { %s1026_s20 = smov 0  }
   0x2 LB: > { %s1035_s21 = sadd.s32 4294967295, %s957_s20   ;;  %s1037_s22 = sadd.s32 1, %s957_s20   ;;  %s957_s20 = sphi %s1026_s20, %s1191_s20   ;;  %s953_s19 = sphi %s1024_s19, %s1190_s19   ;;  %s949_s18 = sphi %s1022_s18, %s1189_s18  }
   0x3   : > { %s129_s23 = ssub.s32 %s957_s20, %s1037_s22  ;;  %s132_s24 = sadd.s32 1, %s953_s19 }
   0x4   : > { %p130_p0 = scmp.eq.s32.totalorder %s129_s23, 0  ;;  %p142_p1 = scmp.ne.s32.totalorder %s953_s19, %s949_s18 }
   0x5   : > { %p143_p2 = scmp.eq.s32.totalorder %s1035_s21, 3  ;;  %p739_p3 = scmp.ge.s32.totalorder %s957_s20, 1 }
   0x6   : > { %s1045_s25 = scalar_select %p130_p0, %s953_s19, %s132_s24  }
   0x7   : > { %p1047_p4 = por %p143_p2, %p142_p1  ;;  %p199_p5 = scmp.lt.s32.totalorder %s957_s20, 5 }
   0x9   : > { %p200_p6 = pnand %p739_p3, %p199_p5 }
   0xa   : > { %s1058_s6 = sshll.u32 (!%p200_p6), %s1035_s21, 2 }
   0xb   : > { %203 = sbr.rel (%p200_p6) target bundleno = 529 (0x211), region = 40  ;;  %p238_p7 = scmp.lt.s32.totalorder (!%p200_p6), %s1058_s6, 12 }
  0x10   : > { %v882_v0 = vld [vmem:[%s1180_s1 + $0x38] sm:$0xff]   ;;  %v991_v1 = vmov 0   ;;  %v883_v2 = vld [vmem:[%s1180_s1 + $0x30] sm:$0xff]   ;;  %s239_s7 = scalar_select %p238_p7, %s1058_s6, 12  ;;  %v884_v3 = vld [vmem:[%s1180_s1 + $0x28] sm:$0xff]   ;;  %vm366_vm0 = vcmask 408576  }
  0x11   : > { %377 = vmatprep.subr.bf16.mxu0 %v991_v1  ;;  %v885_v4 = vld [vmem:[%s1180_s1 + $0x20] sm:$0xff]   ;;  %v886_v8 = vld [vmem:[%s1180_s1 + $0x18] sm:$0xff]   ;;  %v887_v9 = vld [vmem:[%s1180_s1 + $0x10] sm:$0xff]   ;;  %vm373_vm1 = vcmask 1040384   ;;  %vm447_vm2 = vcmask 130048   ;;  %vm503_vm3 = vcmask 64512  }
  0x12   : > { %378 = vmatpush1.bf16.msra.mxu0 %v882_v0  ;;  %s780_s10 = sshll.u32 %s239_s7, 4  ;;  %v888_v10 = vld [vmem:[%s1180_s1 + $0x8] sm:$0xff]   ;;  %v889_v11 = vld [vmem:[%s1180_s1] sm:$0xff]   ;;  %v890_v12 = vld [vmem:[%s1180_s1 + $0x58] ss:$0 sps:$4 sm:$0x11]  }
  0x13   : > { %379 = vmatprep.subr.bf16.mxu0 %v991_v1  ;;  %s1068_s13 = scalar_lea.vmem %s1179_s0, %s780_s10  ;;  %v375_v13 = vsel %vm373_vm1, %v890_v12, 0  ;;  %v891_v14 = vld [vmem:[%s1180_s1 + $0x50] sm:$0xff]   ;;  %v892_v15 = vld [vmem:[%s1180_s1 + $0x48] sm:$0xff]   ;;  %v893_v16 = vld [vmem:[%s1180_s1 + $0x40] sm:$0xff]   ;;  %s781_s29 = sshll.u32 (%p1047_p4), %s1035_s21, 5 }
  0x14   : > { %v256_v5 = vld [vmem:[%s1068_s13 + $0x8] sm:$0xff]  ;;  %v258_v6 = vld [vmem:[%s1068_s13 + $0x18] sm:$0xff]  ;;  %v255_v17 = vld [vmem:[%s1068_s13] sm:$0xff]  ;;  %s1130_s8 = scalar_lea.vmem (%p1047_p4), %s1184_s5, %s781_s29  }
  0x15   : > { %v264_v7 = vpack.c.bf16 %v258_v6, %v256_v5  ;;  %v257_v18 = vld [vmem:[%s1068_s13 + $0x10] sm:$0xff]  ;;  %v260_v19 = vld [vmem:[%s1068_s13 + $0x28] sm:$0xff]  ;;  %v262_v20 = vld [vmem:[%s1068_s13 + $0x38] sm:$0xff] }
  0x16   : > { %380 = vmatpush1.bf16.msra.mxu0 %v883_v2  ;;  %v263_v21 = vpack.c.bf16 %v257_v18, %v255_v17  ;;  %v266_v22 = vpack.c.bf16 %v262_v20, %v260_v19  ;;  %v259_v23 = vld [vmem:[%s1068_s13 + $0x20] sm:$0xff]  ;;  %v261_v24 = vld [vmem:[%s1068_s13 + $0x30] sm:$0xff]  ;;  %s229_s13 = sand.u32 1, %s949_s18   ;;  %s516_s18 = ssub.s32 (%p1047_p4), 13, %s1058_s6 }
  0x17   : > { %381 = vmatprep.subr.bf16.mxu0 %v991_v1  ;;  %757 = vmatprep.mubr.msk.bf16.mxu0 %vm366_vm0, %v264_v7  ;;  %v265_v25 = vpack.c.bf16 %v261_v24, %v259_v23  ;;  %v894_v26 = vld [vmem:[%s1182_s3] sm:$0xff]   ;;  %s740_s23 = sshll.u32 %s229_s13, 5  ;;  %p517_p8 = scmp.lt.s32.totalorder (%p1047_p4), %s516_s18, 4 }
  0x18   : > { %787 = vmatprep.subr.bf16.mxu1 %v894_v26  ;;  %v744_v27 = vld [vmem:[%s1181_s2] ss:$0 sm:$0xff]  ;;  %s1117_s28 = scalar_lea.vmem [#allocation2], %s740_s23  }
  0x19   : > { %788 = vmatpush3.bf16.msra.mxu1 %v894_v26  ;;  %v759_v46 = vld [vmem:[%s1183_s4] ss:$0 sm:$0xff] }
  0x1a   : > { %382 = vmatpush1.bf16.msra.mxu0 %v884_v3 }
  0x1b   : > { %383 = vmatprep.subr.bf16.mxu0 %v991_v1 }
  0x1e   : > { %384 = vmatpush1.bf16.msra.mxu0 %v885_v4 }
  0x1f   : > { %385 = vmatprep.subr.bf16.mxu0 %v991_v1 }
  0x22   : > { %386 = vmatpush1.bf16.msra.mxu0 %v886_v8 }
  0x23   : > { %387 = vmatprep.subr.bf16.mxu0 %v991_v1 }
  0x26   : > { %388 = vmatpush1.bf16.msra.mxu0 %v887_v9 }
  0x27   : > { %389 = vmatprep.subr.bf16.mxu0 %v991_v1 }
  0x2a   : > { %390 = vmatpush1.bf16.msra.mxu0 %v888_v10 }
  0x2b   : > { %391 = vmatprep.subr.bf16.mxu0 %v991_v1 }
  0x2e   : > { %392 = vmatpush1.bf16.msra.mxu0 %v889_v11 }
  0x2f   : > { %401 = vmatprep.subr.bf16.mxu0 %v991_v1 }
  0x32   : > { %402 = vmatpush2.bf16.msra.mxu0 %v375_v13 }
  0x33   : > { %403 = vmatprep.subr.bf16.mxu0 %v991_v1 }
  0x36   : > { %404 = vmatpush2.bf16.msra.mxu0 %v891_v14 }
  0x37   : > { %405 = vmatprep.subr.bf16.mxu0 %v991_v1 }
  0x3a   : > { %406 = vmatpush2.bf16.msra.mxu0 %v892_v15 }
  0x3b   : > { %407 = vmatprep.subr.bf16.mxu0 %v991_v1 }
  0x3e   : > { %408 = vmatpush2.bf16.msra.mxu0 %v893_v16 }
  0x41   : > { %410 = vmatmul.mubr.bf16.vlgmr.msra.gmra.mxu0 %v263_v21 }
  0x42   : > { %758 = vmatprep.mubr.msk.bf16.mxu0 %vm366_vm0, %v266_v22 }
  0x49   : > { %418 = vmatmul.mubr.bf16.gmra.mxu0 %v265_v25 }
 0x101   : > { %v411_v28 = vpop.f32.mrf.mxu0 }
 0x102   : > { %v412_v29 = vadd.f32 %v744_v27, %v411_v28 }
 0x103   : > { %v413_v30 = vpop.f32.mrf.mxu0 }
 0x104   : > { %895 = vtanh.f32 %v412_v29 }
 0x105   : > { %v414_v31 = vpop.f32.mrf.mxu0 }
 0x106   : > { %v415_v32 = vadd.f32 %v744_v27, %v414_v31 }
 0x107   : > { %v416_v33 = vpop.f32.mrf.mxu0 }
 0x108   : > { %897 = vtanh.f32 %v415_v32 }
 0x109   : > { %v419_v34 = vpop.f32.mrf.mxu0 }
 0x10a   : > { %v420_v35 = vadd.f32 %v744_v27, %v419_v34 }
 0x10b   : > { %v421_v36 = vpop.f32.mrf.mxu0 }
 0x10c   : > { %899 = vtanh.f32 %v420_v35 }
 0x10d   : > { %v422_v37 = vpop.f32.mrf.mxu0 }
 0x10e   : > { %v423_v38 = vadd.f32 %v744_v27, %v422_v37 }
 0x10f   : > { %v424_v39 = vpop.f32.mrf.mxu0 }
 0x110   : > { %901 = vtanh.f32 %v423_v38 }
 0x111   : > { %v896_v40 = vpop.eup %895 }
 0x115   : > { %v898_v41 = vpop.eup %897 }
 0x116   : > { %v430_v42 = vpack.c.bf16 %v898_v41, %v896_v40 }
 0x118   : > { %789 = vmatprep.mubr.msk.bf16.mxu1 %vm447_vm2, %v430_v42 }
 0x119   : > { %v900_v43 = vpop.eup %899 }
 0x11d   : > { %v902_v44 = vpop.eup %901 }
 0x11e   : > { %v431_v45 = vpack.c.bf16 %v902_v44, %v900_v43 }
 0x120   : > { %790 = vmatmul.mubr.msk.bf16.vlgmr.msra.gmra.mxu1 %vm447_vm2, %v431_v45 }
 0x1e0   : > { %v791_v47 = vpop.f32.mrf.mxu1 }
 0x1e1   : > { %v497_v48 = vadd.f32 %v791_v47, %v759_v46 }
 0x1e2   : > { %v488_v49 = vpop.f32.mrf.mxu1 }
 0x1e3   : > { %506 = vst.msk [vmem:[%s1117_s28 + $0x10] sm:$0xff] %vm503_vm3, %v497_v48  ;;  %v489_v50 = vadd.f32 %v759_v46, %v488_v49 }
 0x1e4   : > { %v792_v51 = vpop.f32.mrf.mxu1 }
 0x1e5   : > { %504 = vst.msk [vmem:[%s1117_s28] sm:$0xff] %vm503_vm3, %v489_v50  ;;  %v500_v52 = vadd.f32 %v792_v51, %v759_v46  ;;  %514 = sbr.rel (!%p1047_p4) target bundleno = 529 (0x211), region = 44 }
 0x1e6   : > { %v491_v53 = vpop.f32.mrf.mxu1 }
 0x1e7   : > { %507 = vst.msk [vmem:[%s1117_s28 + $0x18] sm:$0xff] %vm503_vm3, %v500_v52  ;;  %v492_v54 = vadd.f32 %v759_v46, %v491_v53 }
 0x1e9   : > { %505 = vst.msk [vmem:[%s1117_s28 + $0x8] sm:$0xff] %vm503_vm3, %v492_v54 }
 0x1ea   : > { %s1193_s18 = smov (!%p517_p8, %s516_s18), 4 }
 0x1eb   : > { %s765_s9 = sshll.u32 %s1193_s18, 7 }
 0x1ec   : > { %p768_p9 = scmp.eq.s32.totalorder %s765_s9, 0 }
 0x1ed   : > { %s1136_s10 = sshrl.u32 (!%p768_p9), %s1193_s18, 2 }
 0x1ee   : > { %525 = sbr.rel (%p768_p9) target bundleno = 529 (0x211), region = 48  ;;  %p769_p10 = scmp.le.s32.totalorder (!%p768_p9), %s1136_s10, 0 }
 0x1f3   : > { %692 = sbr.rel (%p769_p10) target bundleno = 512 (0x200), region = 124  ;;  %s1186_s21 = smov (!%p769_p10), %s1130_s8 }
 0x1f4   : > { %s1187_s26 = smov (!%p769_p10), %s1117_s28  ;;  %s1145_s6 = smov (!%p769_p10), 0  }
 0x1f5   : > { %s971_s11 = smov (!%p769_p10), 0  }
 0x1f8 LB: >> { %v594_v55 = vld [vmem:[%s965_s26] sm:$0xff]  ;;  %v596_v56 = vld [vmem:[%s965_s26 + $0x8] sm:$0xff]  ;;  %v598_v57 = vld [vmem:[%s965_s26 + $0x10] sm:$0xff]  ;;  %s602_s12 = sadd.s32 1, %s969_s6  ;;  %s588_s11 = sadd.s32 1, %s973_s11   ;;  %s973_s11 = sphi %s971_s11, %s588_s11   ;;  %s969_s6 = sphi %s1145_s6, %s1188_s6   ;;  %s965_s26 = sphi %s1187_s26, %s607_s26   ;;  %s961_s21 = sphi %s1186_s21, %s608_s21  }
 0x1f9   : >> { %595 = vst [vmem:[%s961_s21] sm:$0xff] %v594_v55  ;;  %597 = vst [vmem:[%s961_s21 + $0x8] sm:$0xff] %v596_v56  ;;  %v600_v58 = vld [vmem:[%s965_s26 + $0x18] sm:$0xff]  ;;  %p603_p11 = scmp.ge.s32.totalorder %s602_s12, %s1136_s10  ;;  %p587_p12 = scmp.ge.s32.totalorder %s588_s11, %s1136_s10 }
 0x1fa   : >> { %599 = vst [vmem:[%s961_s21 + $0x10] sm:$0xff] %v598_v57  ;;  %601 = vst [vmem:[%s961_s21 + $0x18] sm:$0xff] %v600_v58 }
 0x1fb   : >> { %s1195_s12 = smov (%p603_p11, %s602_s12), 0  ;;  %590 = sbr.rel (!%p587_p12) target bundleno = 504 (0x1f8), region = 130 }
 0x1fc   : >> { %s770_s14 = sshll.u32 %s1195_s12, 5  ;;  %s1188_s6 = smov %s1195_s12 }
 0x1fd   : >> { %s607_s26 = scalar_lea.vmem %s1117_s28, %s770_s14 [#allocation2]   ;;  %s608_s21 = scalar_lea.vmem %s1130_s8, %s770_s14  }
 0x200 PF: > { %s1161_s15 = sand.u32 3, %s1193_s18   ;;  %s782_s16 = sshll.u32 %s1136_s10, 5 }
 0x201   : > { %s613_s17 = scalar_lea.vmem %s1117_s28, %s782_s16 [#allocation2]   ;;  %s615_s20 = scalar_lea.vmem %s1130_s8, %s782_s16  }
 0x202   : > { %p775_p13 = scmp.le.s32.totalorder %s1161_s15, 0 }
 0x203   : > { %s975_s13 = smov (!%p775_p13), %s615_s20   ;;  %s979_s23 = smov (!%p775_p13), %s613_s17  }
 0x204   : > { %706 = sbr.rel (%p775_p13) target bundleno = 529 (0x211), region = 135  ;;  %s983_s24 = smov (!%p775_p13), 0  }
 0x205   : > { %s987_s27 = smov (!%p775_p13), 0  }
 0x209 LB: >> { %v625_v59 = vld [vmem:[%s981_s23] sm:$0xff]  ;;  %s627_s18 = sadd.s32 1, %s985_s24  ;;  %s619_s27 = sadd.s32 1, %s989_s27   ;;  %s989_s27 = sphi %s987_s27, %s619_s27   ;;  %s985_s24 = sphi %s983_s24, %s984_s24   ;;  %s981_s23 = sphi %s979_s23, %s632_s23   ;;  %s977_s13 = sphi %s975_s13, %s633_s13  }
 0x20a   : >> { %626 = vst [vmem:[%s977_s13] sm:$0xff] %v625_v59  ;;  %p628_p0 = scmp.ge.s32.totalorder %s627_s18, %s1161_s15  ;;  %p618_p1 = scmp.ge.s32.totalorder %s619_s27, %s1161_s15 }
 0x20c   : >> { %s1197_s18 = smov (%p628_p0, %s627_s18), 0  ;;  %621 = sbr.rel (!%p618_p1) target bundleno = 521 (0x209), region = 141 }
 0x20d   : >> { %s776_s28 = sshll.u32 %s1197_s18, 3  ;;  %s984_s24 = smov %s1197_s18  }
 0x20e   : >> { %s632_s23 = scalar_lea.vmem %s613_s17, %s776_s28 [#allocation2]   ;;  %s633_s13 = scalar_lea.vmem %s615_s20, %s776_s28  }
 0x211 PF: > { %p12_p2 = scmp.ge.s32.totalorder %s1037_s22, 6   ;;  %s1189_s18 = smov %s953_s19 }
 0x212   : > { %s1190_s19 = smov %s1045_s25  ;;  %s1191_s20 = smov %s1037_s22 }
 0x213   :  { %14 = sbr.rel (!%p12_p2) target bundleno = 2 (0x2), region = 152 }

</bundles_post_ra>
